<compile_context>
chip_gen: v7x
topology: tpu7x:2x2x1
jax: 0.10.0
libtpu: 0.0.40
codegen_flags: <defaults>
</compile_context>

<pallas_src>
import functools

import jax
import jax.numpy as jnp
from jax.experimental import pallas as pl
from jax.experimental.pallas import tpu as pltpu


def _ce_label_smooth_kernel(logits_ref, targets_ref, loss_ref, *,
                            epsilon, num_classes):
    x = logits_ref[...].astype(jnp.float32)          # (TB, K)
    t = targets_ref[...]                              # (TB, 1) int32
    tb, k = x.shape

    # Numerically stable shift (cancels algebraically in the final formula but
    # keeps exp() in range; garbage rows of a partial block stay row-local).
    m = jnp.max(x, axis=1, keepdims=True)             # (TB, 1)
    z = x - m                                          # (TB, K)
    lse = jnp.log(jnp.sum(jnp.exp(z), axis=1, keepdims=True))     # (TB, 1)

    # Shifted logit at the target class via a masked reduce (no one-hot matmul).
    class_ids = jax.lax.broadcasted_iota(jnp.int32, (tb, k), 1)
    z_t = jnp.sum(jnp.where(class_ids == t, z, 0.0), axis=1, keepdims=True)
    sum_z = jnp.sum(z, axis=1, keepdims=True)

    # loss = -[(1-eps)*logp_t + (eps/K)*sum_k logp_k]
    #      = lse - (1-eps)*z_t - (eps/K)*sum_z
    loss_ref[...] = (lse
                     - (1.0 - epsilon) * z_t
                     - (epsilon / num_classes) * sum_z)


def _pick_batch_tile(b, k, itemsize, max_rows=None):
    """Batch-tile rows such that 2x-buffered logits DMA (input dtype) plus ~4
    f32 temps per element fit a ~32 MiB budget; cap 2048 rows, floor 8."""
    budget = 32 * 1024 * 1024
    bytes_per_row = 2 * k * itemsize + 4 * k * 4
    tb = min(2048, max(8, budget // bytes_per_row))
    if max_rows is not None:
        tb = min(tb, int(max_rows))
    tb = max(8, (tb // 8) * 8)        # block dim must be a multiple of 8 ...
    if b <= tb:
        tb = b                        # ... or equal to the full batch dim
    return tb


def cross_entropy_label_smooth(logits, targets, *, epsilon=0.1, reduction=True,
                               max_rows_per_tile=None):
    """logits: (B, K) float (f32 or bf16); targets: (B,) int class indices."""
    b, k = logits.shape
    targets2d = targets.astype(jnp.int32).reshape(b, 1)

    tb = _pick_batch_tile(b, k, jnp.dtype(logits.dtype).itemsize,
                          max_rows_per_tile)
    num_tiles = pl.cdiv(b, tb)         # partial last block handled by Pallas

    kernel = functools.partial(
        _ce_label_smooth_kernel, epsilon=float(epsilon), num_classes=k)

    per_row = pl.pallas_call(
        kernel,
        out_shape=jax.ShapeDtypeStruct((b, 1), jnp.float32),
        grid_spec=pltpu.PrefetchScalarGridSpec(
            num_scalar_prefetch=0,
            grid=(num_tiles,),
            in_specs=[
                pl.BlockSpec((tb, k), lambda i: (i, 0)),   # logits tile
                pl.BlockSpec((tb, 1), lambda i: (i, 0)),   # targets tile
            ],
            out_specs=pl.BlockSpec((tb, 1), lambda i: (i, 0)),
        ),
        compiler_params=pltpu.CompilerParams(
            dimension_semantics=("parallel",),      # megacore-shardable batch
            vmem_limit_bytes=48 * 1024 * 1024),
    )(logits, targets2d)[:, 0]

    if reduction:
        return jnp.mean(per_row)       # cheap XLA reduce over B floats
    return per_row


def _reference(logits, targets, epsilon=0.1, reduction=True):
    k = logits.shape[1]
    log_probs = jax.nn.log_softmax(logits.astype(jnp.float32), axis=1)
    onehot = jax.nn.one_hot(targets, k, dtype=jnp.float32)
    smoothed = (1.0 - epsilon) * onehot + epsilon / k
    loss = jnp.sum(-smoothed * log_probs, axis=1)
    return jnp.mean(loss) if reduction else loss


if __name__ == "__main__":
    key = jax.random.PRNGKey(0)
    k1, k2, k3, k4 = jax.random.split(key, 4)

    # Small shapes consistent with the module: (batch, num_classes) logits.
    batch, num_classes = 8, 16
    logits = jax.random.normal(k1, (batch, num_classes), dtype=jnp.float32)
    targets = jax.random.randint(k2, (batch,), 0, num_classes, dtype=jnp.int32)

    loss = cross_entropy_label_smooth(logits, targets, epsilon=0.1,
                                      reduction=True)
    jax.block_until_ready(loss)
    ref = _reference(logits, targets, epsilon=0.1, reduction=True)
    assert jnp.allclose(loss, ref, atol=1e-5, rtol=1e-5), (loss, ref)

    # reduction=False path
    loss_vec = cross_entropy_label_smooth(logits, targets, epsilon=0.1,
                                          reduction=False)
    jax.block_until_ready(loss_vec)
    ref_vec = _reference(logits, targets, epsilon=0.1, reduction=False)
    assert jnp.allclose(loss_vec, ref_vec, atol=1e-5, rtol=1e-5)

    # Batch not a multiple of 8 — single full-extent block (no padding anywhere).
    batch2 = 20
    logits2 = jax.random.normal(k3, (batch2, num_classes), dtype=jnp.float32)
    targets2 = jax.random.randint(k4, (batch2,), 0, num_classes,
                                  dtype=jnp.int32)
    loss2 = cross_entropy_label_smooth(logits2, targets2, epsilon=0.1,
                                       reduction=True)
    jax.block_until_ready(loss2)
    ref2 = _reference(logits2, targets2, epsilon=0.1, reduction=True)
    assert jnp.allclose(loss2, ref2, atol=1e-5, rtol=1e-5), (loss2, ref2)

    # Force multiple tiles with a partial last block (B=20, TB=8 -> 3 tiles);
    # exercises the no-pad / OOB-read / masked-write path end to end.
    loss3 = cross_entropy_label_smooth(logits2, targets2, epsilon=0.1,
                                       reduction=True, max_rows_per_tile=8)
    jax.block_until_ready(loss3)
    assert jnp.allclose(loss3, ref2, atol=1e-5, rtol=1e-5), (loss3, ref2)

    # bf16 logits path (kernel upcasts internally).
    logits_bf16 = logits.astype(jnp.bfloat16)
    loss_bf = cross_entropy_label_smooth(logits_bf16, targets, epsilon=0.1,
                                         reduction=True)
    jax.block_until_ready(loss_bf)
    ref_bf = _reference(logits_bf16, targets, epsilon=0.1, reduction=True)
    assert jnp.allclose(loss_bf, ref_bf, atol=1e-4, rtol=1e-4), (loss_bf, ref_bf)

    print("KERNEL_OK")
</pallas_src>

<mosaic_0001>
module attributes {stable_mosaic.version = 11 : i64} {
  func.func @_ce_label_smooth_kernel(%arg0: i32, %arg1: memref<8x16xf32, #tpu.memory_space<vmem>>, %arg2: memref<8x1xi32, #tpu.memory_space<vmem>>, %arg3: memref<8x1xf32, #tpu.memory_space<vmem>>) attributes {dimension_semantics = [#tpu.dimension_semantics<parallel>], iteration_bounds = array<i64: 1>, scalar_prefetch = 0 : i64, scratch_operands = 0 : i64, tpu.core_type = #tpu.core_type<tc>, window_params = [{transform_indices = @transform_0, window_bounds = array<i64: 8, 16>}, {transform_indices = @transform_1, window_bounds = array<i64: 8, 1>}, {transform_indices = @transform_2, window_bounds = array<i64: 8, 1>}]} {
    %c0 = arith.constant 0 : index
    %c0_0 = arith.constant 0 : index
    %0 = vector.load %arg1[%c0, %c0_0] : memref<8x16xf32, #tpu.memory_space<vmem>>, vector<8x16xf32>
    %c0_1 = arith.constant 0 : index
    %c0_2 = arith.constant 0 : index
    %1 = vector.load %arg2[%c0_1, %c0_2] : memref<8x1xi32, #tpu.memory_space<vmem>>, vector<8x1xi32>
    %cst = arith.constant dense<0xFF800000> : vector<8xf32>
    %2 = vector.multi_reduction <maximumf>, %0, %cst [1] : vector<8x16xf32> to vector<8xf32>
    %3 = vector.shape_cast %2 : vector<8xf32> to vector<8x1xf32>
    %4 = vector.broadcast %3 : vector<8x1xf32> to vector<8x16xf32>
    %5 = arith.subf %0, %4 : vector<8x16xf32>
    %6 = math.exp %5 : vector<8x16xf32>
    %cst_3 = arith.constant dense<0.000000e+00> : vector<8xf32>
    %7 = vector.multi_reduction <add>, %6, %cst_3 [1] : vector<8x16xf32> to vector<8xf32>
    %8 = vector.shape_cast %7 : vector<8xf32> to vector<8x1xf32>
    %9 = math.log %8 : vector<8x1xf32>
    %10 = tpu.iota {dimensions = array<i32: 1>} : vector<8x16xi32>
    %11 = vector.broadcast %1 : vector<8x1xi32> to vector<8x16xi32>
    %12 = arith.cmpi eq, %10, %11 : vector<8x16xi32>
    %cst_4 = arith.constant 0.000000e+00 : f32
    %13 = vector.broadcast %cst_4 : f32 to vector<8x16xf32>
    %14 = arith.select %12, %5, %13 : vector<8x16xi1>, vector<8x16xf32>
    %cst_5 = arith.constant dense<0.000000e+00> : vector<8xf32>
    %15 = vector.multi_reduction <add>, %14, %cst_5 [1] : vector<8x16xf32> to vector<8xf32>
    %16 = vector.shape_cast %15 : vector<8xf32> to vector<8x1xf32>
    %cst_6 = arith.constant dense<0.000000e+00> : vector<8xf32>
    %17 = vector.multi_reduction <add>, %5, %cst_6 [1] : vector<8x16xf32> to vector<8xf32>
    %18 = vector.shape_cast %17 : vector<8xf32> to vector<8x1xf32>
    %cst_7 = arith.constant 0.899999976 : f32
    %19 = vector.broadcast %cst_7 : f32 to vector<8x1xf32>
    %20 = arith.mulf %19, %16 : vector<8x1xf32>
    %21 = arith.subf %9, %20 : vector<8x1xf32>
    %cst_8 = arith.constant 6.250000e-03 : f32
    %22 = vector.broadcast %cst_8 : f32 to vector<8x1xf32>
    %23 = arith.mulf %22, %18 : vector<8x1xf32>
    %24 = arith.subf %21, %23 : vector<8x1xf32>
    %c0_9 = arith.constant 0 : index
    %c0_10 = arith.constant 0 : index
    %25 = vector.load %arg3[%c0_9, %c0_10] : memref<8x1xf32, #tpu.memory_space<vmem>>, vector<8x1xf32>
    tpu.vector_store %arg3[%c0_9, %c0_10], %24 {strides = array<i32>} : memref<8x1xf32, #tpu.memory_space<vmem>>, vector<8x1xf32>,
    return
  }
  func.func @transform_0(%arg0: i32) -> (i32, i32) {
    %c0_i32 = arith.constant 0 : i32
    %c0_i32_0 = arith.constant 0 : i32
    return %arg0, %c0_i32 : i32, i32
  }
  func.func @transform_1(%arg0: i32) -> (i32, i32) {
    %c0_i32 = arith.constant 0 : i32
    %c0_i32_0 = arith.constant 0 : i32
    return %arg0, %c0_i32 : i32, i32
  }
  func.func @transform_2(%arg0: i32) -> (i32, i32) {
    %c0_i32 = arith.constant 0 : i32
    %c0_i32_0 = arith.constant 0 : i32
    return %arg0, %c0_i32 : i32, i32
  }
}

</mosaic_0001>

<bundles_post_ra>
// kernel: tpu_custom_call.1
= control target key start
LH: loop header
LB: loop body
LE: loop exit
PB: predicated region body
PF: predicated region fallthrough
CT: control target
= control target key end

     0   :  { %vm13_vm0 = vcmask 130048   ;;  %v54_v1 = vmov 0   ;;  %v25_v7 = vlaneseq  ;;  %vm42_vm2 = vcmask 7168   ;;  %s83_s0 = inlined_call_operand.vmem [shape: f32[8,16], index: 0, kind: input, shape index: {}]   ;;  %s84_s1 = inlined_call_operand.vmem [shape: s32[8,1], index: 1, kind: input, shape index: {}]   ;;  %s85_s2 = inlined_call_operand.vmem [shape: f32[8,1], index: 2, kind: output, shape index: {}]  }
   0x1   :  { %v11_v0 = vld [vmem:[%s83_s0] sm:$0xff]  ;;  %49 = vset.pattern.permute.xlu0 %v54_v1 }
   0x2   :  { %v14_v2 = vsel %vm13_vm0, %v11_v0, -inf  ;;  %v12_v3 = vld [vmem:[%s84_s1] sm:$0xff]  ;;  %v26_v8 = vand.u32 127, %v25_v7 }
   0x3   :  { %15 = vmax.xlane.f32.xlu0 %v14_v2 }
  0x19   :  { %28 = vperm.xlu0 %49, %v12_v3  }
  0x90   :  { %v16_v4 = vpop.xlane.xlu0 %15 }
  0x91   :  { %v17_v5 = vsub.f32 %v11_v0, %v16_v4 }
  0x93   :  { %v18_v6 = vmul.f32 1.442695, %v17_v5  ;;  %v35_v14 = vsel %vm13_vm0, %v17_v5, 0.0 }
  0x95   :  { %50 = vpow2.f32 %v18_v6 }
  0x98   :  { %v29_v9 = vpop.permute.xlu0 %28 }
  0x99   :  { %vm30_vm1 = vcmp.eq.s32.totalorder %v26_v8, %v29_v9 }
  0x9a   :  { %v31_v12 = vsel %vm30_vm1, %v17_v5, 0.0 }
  0x9b   :  { %v32_v13 = vsel %vm13_vm0, %v31_v12, 0.0 }
  0x9f   :  { %v51_v10 = vpop.eup %50 }
  0xa0   :  { %v20_v11 = vsel %vm13_vm0, %v51_v10, 0.0 }
  0xa1   :  { %21 = vadd.xlane.f32.xlu1 %v20_v11 }
  0xa5   :  { %33 = vadd.xlane.f32.xlu1 %v32_v13 }
  0xa9   :  { %36 = vadd.xlane.f32.xlu1 %v35_v14 }
 0x12e   :  { %v22_v15 = vpop.xlane.xlu1 %21 }
 0x12f   :  { %52 = vlog2.f32 %v22_v15 }
 0x132   :  { %v34_v16 = vpop.xlane.xlu1 %33 }
 0x133   :  { %v38_v20 = vmul.f32 0.9, %v34_v16 }
 0x136   :  { %v37_v18 = vpop.xlane.xlu1 %36 }
 0x137   :  { %v40_v22 = vmul.f32 0.00625, %v37_v18 }
 0x139   :  { %v53_v17 = vpop.eup %52 }
 0x13a   :  { %v24_v19 = vmul.f32 0.6931472, %v53_v17 }
 0x13c   :  { %v39_v21 = vsub.f32 %v24_v19, %v38_v20 }
 0x13e   :  { %v41_v23 = vsub.f32 %v39_v21, %v40_v22 }
 0x140   :  { %43 = vst.msk [vmem:[%s85_s2] sm:$0xff] %vm42_vm2, %v41_v23 }

</bundles_post_ra>
